<compile_context>
chip_gen: v7x
topology: tpu7x:2x2x1
jax: 0.10.0
libtpu: 0.0.40
codegen_flags: <defaults>
</compile_context>

<pallas_src>
import functools

import jax
import jax.numpy as jnp
from jax import lax
from jax.experimental import pallas as pl
from jax.experimental.pallas import tpu as pltpu


def _round_up(x, m):
    return ((x + m - 1) // m) * m


def _dbp_loss_kernel(p_ref, t_ref, o_ref, *, rows, tr, steps, unroll):
    c = pl.program_id(0)          # parallel axis (TensorCore split on v7x)
    j = pl.program_id(1)          # serial reduction axis

    @pl.when(j == 0)
    def _init():
        o_ref[...] = jnp.zeros_like(o_ref)

    blk = c * steps + j           # logical (unclamped) block index
    rows_left = rows - blk * tr   # valid rows remaining at this block's start

    def load_slab(s):
        start = pl.multiple_of(s * 8, 8)
        p = p_ref[pl.ds(start, 8), :].astype(jnp.float32)
        t = t_ref[pl.ds(start, 8), :].astype(jnp.float32)
        return p, t

    # Fast path: block fully inside the valid row range -> no masking work.
    @pl.when(rows_left >= tr)
    def _full_block():
        def body(s, acc):
            p, t = load_slab(s)
            # |t - p| * (1/t): reciprocal on the EUP slot, sub/mul/abs/add on the VPU.
            return acc + jnp.abs((t - p) * pl.reciprocal(t, approx=False))

        o_ref[...] += lax.fori_loop(0, tr // 8, body,
                                    jnp.zeros((8, 128), jnp.float32),
                                    unroll=unroll)

    # Tail path: last (possibly partial or fully out-of-range) block -> row masking.
    @pl.when(rows_left < tr)
    def _partial_block():
        row_iota = lax.broadcasted_iota(jnp.int32, (8, 128), 0)

        def body(s, acc):
            p, t = load_slab(s)
            mask = (row_iota + s * 8) < rows_left
            # Select safe values BEFORE the reciprocal: garbage rows -> |1-1|/1 == 0.
            t_safe = jnp.where(mask, t, jnp.float32(1.0))
            p_safe = jnp.where(mask, p, jnp.float32(1.0))
            return acc + jnp.abs((t_safe - p_safe) * pl.reciprocal(t_safe, approx=False))

        n_slabs = jnp.maximum(pl.cdiv(rows_left, 8), 0)   # 0 for clamped overshoot blocks
        o_ref[...] += lax.fori_loop(0, n_slabs, body,
                                    jnp.zeros((8, 128), jnp.float32))


def dbp_loss(predictions, targets, *, block_rows=4096, num_cores=2):
    """Pallas TPU equivalent of dbpLoss.forward (mean absolute percentage error)."""
    p = jnp.squeeze(predictions)              # matches torch.squeeze
    t = jnp.asarray(targets)
    assert p.shape == t.shape and p.ndim == 1, "expected 1-D after squeeze"
    n = p.shape[0]

    # ---- pack as (rows, 128): free reshape when n % 128 == 0 -------------------------
    rem = n % 128
    if rem:
        # Pad ONLY to the next 128 multiple (<=127 elems); 1.0 pads contribute exactly 0.
        # TODO(synk): unaligned n still costs one small pad copy per input (no clean way
        # to reshape a non-multiple-of-128 1-D HBM buffer into a (rows,128) view).
        pad = 128 - rem
        p = jnp.pad(p, (0, pad), constant_values=1)
        t = jnp.pad(t, (0, pad), constant_values=1)
    rows = pl.cdiv(n, 128)
    p2 = p.reshape(rows, 128)
    t2 = t.reshape(rows, 128)

    # ---- tiling -----------------------------------------------------------------------
    tr = max(8, min(_round_up(block_rows, 8), _round_up(rows, 8)))
    if p2.dtype.itemsize == 2 or t2.dtype.itemsize == 2:
        tr = _round_up(tr, 16)                 # native (16,128) tiles for 16-bit inputs
    total_blocks = pl.cdiv(rows, tr)
    ncores = max(1, min(num_cores, total_blocks))
    steps = pl.cdiv(total_blocks, ncores)

    def in_index(c, j):
        # Clamp overshoot blocks (when ncores doesn't divide total_blocks) to a valid
        # block; the kernel masks them out via rows_left <= 0.
        return (jnp.minimum(c * steps + j, total_blocks - 1), 0)

    kernel = functools.partial(_dbp_loss_kernel, rows=rows, tr=tr, steps=steps,
                               unroll=min(8, max(1, tr // 8)))

    bytes_in = p2.size * p2.dtype.itemsize + t2.size * t2.dtype.itemsize
    partials = pl.pallas_call(
        kernel,
        out_shape=jax.ShapeDtypeStruct((ncores, 8, 128), jnp.float32),
        grid_spec=pltpu.PrefetchScalarGridSpec(
            num_scalar_prefetch=0,
            grid=(ncores, steps),
            in_specs=[
                pl.BlockSpec((tr, 128), in_index),
                pl.BlockSpec((tr, 128), in_index),
            ],
            # Per-core (8,128) partial sum used directly as the accumulator (resident
            # across the inner reduction axis). No shared SMEM scalar -> no cross-core race.
            out_specs=pl.BlockSpec((None, 8, 128), lambda c, j: (c, 0, 0)),
        ),
        compiler_params=pltpu.CompilerParams(
            dimension_semantics=("parallel", "arbitrary"),
            vmem_limit_bytes=32 * 1024 * 1024,
        ),
        cost_estimate=pl.CostEstimate(
            flops=4 * n,
            transcendentals=n,
            bytes_accessed=bytes_in + ncores * 8 * 128 * 4,
        ),
    )(p2, t2)

    # Single tiny cross-lane reduction + 1/N scale outside the kernel.
    return jnp.sum(partials) / jnp.float32(n)


if __name__ == "__main__":
    key = jax.random.PRNGKey(0)
    kp, kt = jax.random.split(key)

    # Small demo consistent with the module: (N, 1) regression-head output, (N,) targets.
    N = 8
    predictions = jax.random.normal(kp, (N, 1), dtype=jnp.float32) * 5.0 + 70.0
    targets = jax.random.normal(kt, (N,), dtype=jnp.float32) * 5.0 + 72.0

    loss = jax.block_until_ready(dbp_loss(predictions, targets))
    ref = jnp.mean(jnp.abs((targets - jnp.squeeze(predictions)) / targets))
    assert jnp.allclose(loss, ref, rtol=1e-6, atol=1e-6), (loss, ref)

    # Unaligned N + tiny blocks: exercises the 128-pad path, the multi-block grid,
    # the two-way parallel split, and the clamped overshoot block.
    N2 = 5000
    kp2, kt2 = jax.random.split(jax.random.PRNGKey(1))
    predictions2 = jax.random.normal(kp2, (N2, 1), dtype=jnp.float32) * 5.0 + 70.0
    targets2 = jax.random.normal(kt2, (N2,), dtype=jnp.float32) * 5.0 + 72.0
    loss2 = jax.block_until_ready(dbp_loss(predictions2, targets2, block_rows=8))
    ref2 = jnp.mean(jnp.abs((targets2 - jnp.squeeze(predictions2)) / targets2))
    assert jnp.allclose(loss2, ref2, rtol=1e-5, atol=1e-6), (loss2, ref2)

    # 128-aligned N (no pad, free reshape), two full blocks split across the parallel axis.
    N3 = 4096
    kp3, kt3 = jax.random.split(jax.random.PRNGKey(2))
    predictions3 = jax.random.normal(kp3, (N3, 1), dtype=jnp.float32) * 5.0 + 70.0
    targets3 = jax.random.normal(kt3, (N3,), dtype=jnp.float32) * 5.0 + 72.0
    loss3 = jax.block_until_ready(dbp_loss(predictions3, targets3, block_rows=16))
    ref3 = jnp.mean(jnp.abs((targets3 - jnp.squeeze(predictions3)) / targets3))
    assert jnp.allclose(loss3, ref3, rtol=1e-5, atol=1e-6), (loss3, ref3)

    print("KERNEL_OK")
</pallas_src>

<mosaic_0001>
module attributes {stable_mosaic.version = 11 : i64} {
  func.func @_dbp_loss_kernel(%arg0: i32, %arg1: i32, %arg2: memref<8x128xf32, #tpu.memory_space<vmem>>, %arg3: memref<8x128xf32, #tpu.memory_space<vmem>>, %arg4: memref<1x8x128xf32, #tpu.memory_space<vmem>>) attributes {dimension_semantics = [#tpu.dimension_semantics<parallel>, #tpu.dimension_semantics<arbitrary>], iteration_bounds = array<i64: 1, 1>, scalar_prefetch = 0 : i64, scratch_operands = 0 : i64, tpu.core_type = #tpu.core_type<tc>, window_params = [{transform_indices = @transform_0, window_bounds = array<i64: 8, 128>}, {transform_indices = @transform_1, window_bounds = array<i64: 8, 128>}, {transform_indices = @transform_2, window_bounds = array<i64: 1, 8, 128>}]} {
    %c0_i32 = arith.constant 0 : i32
    %0 = arith.cmpi eq, %arg1, %c0_i32 : i32
    %1 = arith.extui %0 : i1 to i32
    %c0_i32_0 = arith.constant 0 : i32
    %2 = arith.cmpi ne, %1, %c0_i32_0 : i32
    scf.if %2 {
      %cst = arith.constant 0.000000e+00 : f32
      %13 = vector.broadcast %cst : f32 to vector<8x128xf32>
      %c0 = arith.constant 0 : index
      %c0_6 = arith.constant 0 : index
      %c0_7 = arith.constant 0 : index
      %14 = vector.load %arg4[%c0, %c0_6, %c0_7] : memref<1x8x128xf32, #tpu.memory_space<vmem>>, vector<1x8x128xf32>
      %15 = vector.shape_cast %14 : vector<1x8x128xf32> to vector<8x128xf32>
      %16 = vector.shape_cast %13 : vector<8x128xf32> to vector<1x8x128xf32>
      tpu.vector_store %arg4[%c0, %c0_6, %c0_7], %16 {strides = array<i32>} : memref<1x8x128xf32, #tpu.memory_space<vmem>>, vector<1x8x128xf32>,
    } else {
    }
    %c1_i32 = arith.constant 1 : i32
    %3 = arith.muli %arg0, %c1_i32 : i32
    %4 = arith.addi %3, %arg1 : i32
    %c8_i32 = arith.constant 8 : i32
    %5 = arith.muli %4, %c8_i32 : i32
    %c1_i32_1 = arith.constant 1 : i32
    %6 = arith.subi %c1_i32_1, %5 : i32
    %c8_i32_2 = arith.constant 8 : i32
    %7 = arith.cmpi sge, %6, %c8_i32_2 : i32
    %8 = arith.extui %7 : i1 to i32
    %c0_i32_3 = arith.constant 0 : i32
    %9 = arith.cmpi ne, %8, %c0_i32_3 : i32
    scf.if %9 {
      %c0 = arith.constant 0 : index
      %c0_6 = arith.constant 0 : index
      %c0_7 = arith.constant 0 : index
      %13 = vector.load %arg4[%c0, %c0_6, %c0_7] : memref<1x8x128xf32, #tpu.memory_space<vmem>>, vector<1x8x128xf32>
      %14 = vector.shape_cast %13 : vector<1x8x128xf32> to vector<8x128xf32>
      %cst = arith.constant 0.000000e+00 : f32
      %15 = vector.broadcast %cst : f32 to vector<8x128xf32>
      %c0_i32_8 = arith.constant 0 : i32
      %c8_i32_9 = arith.constant 8 : i32
      %16 = arith.muli %c0_i32_8, %c8_i32_9 : i32
      %17 = tpu.assume_multiple %16, 8 : i32
      %18 = arith.index_cast %17 : i32 to index
      %c0_10 = arith.constant 0 : index
      %19 = vector.load %arg2[%18, %c0_10] : memref<8x128xf32, #tpu.memory_space<vmem>>, vector<8x128xf32>
      %20 = arith.index_cast %17 : i32 to index
      %c0_11 = arith.constant 0 : index
      %21 = vector.load %arg3[%20, %c0_11] : memref<8x128xf32, #tpu.memory_space<vmem>>, vector<8x128xf32>
      %22 = arith.subf %21, %19 : vector<8x128xf32>
      %23 = tpu.reciprocal %21 : vector<8x128xf32> -> vector<8x128xf32>
      %24 = arith.mulf %22, %23 : vector<8x128xf32>
      %25 = math.absf %24 : vector<8x128xf32>
      %26 = arith.addf %15, %25 : vector<8x128xf32>
      %c1_i32_12 = arith.constant 1 : i32
      %27 = arith.addf %14, %26 : vector<8x128xf32>
      %c0_13 = arith.constant 0 : index
      %c0_14 = arith.constant 0 : index
      %c0_15 = arith.constant 0 : index
      %28 = vector.load %arg4[%c0_13, %c0_14, %c0_15] : memref<1x8x128xf32, #tpu.memory_space<vmem>>, vector<1x8x128xf32>
      %29 = vector.shape_cast %28 : vector<1x8x128xf32> to vector<8x128xf32>
      %30 = vector.shape_cast %27 : vector<8x128xf32> to vector<1x8x128xf32>
      tpu.vector_store %arg4[%c0_13, %c0_14, %c0_15], %30 {strides = array<i32>} : memref<1x8x128xf32, #tpu.memory_space<vmem>>, vector<1x8x128xf32>,
    } else {
    }
    %c8_i32_4 = arith.constant 8 : i32
    %10 = arith.cmpi slt, %6, %c8_i32_4 : i32
    %11 = arith.extui %10 : i1 to i32
    %c0_i32_5 = arith.constant 0 : i32
    %12 = arith.cmpi ne, %11, %c0_i32_5 : i32
    scf.if %12 {
      %13 = tpu.iota {dimensions = array<i32: 0>} : vector<8x128xi32>
      %c7_i32 = arith.constant 7 : i32
      %14 = arith.addi %6, %c7_i32 : i32
      %c8_i32_6 = arith.constant 8 : i32
      %15 = arith.divsi %14, %c8_i32_6 : i32
      %c0_i32_7 = arith.constant 0 : i32
      %16 = arith.maxsi %15, %c0_i32_7 : i32
      %c0 = arith.constant 0 : index
      %c0_8 = arith.constant 0 : index
      %c0_9 = arith.constant 0 : index
      %17 = vector.load %arg4[%c0, %c0_8, %c0_9] : memref<1x8x128xf32, #tpu.memory_space<vmem>>, vector<1x8x128xf32>
      %18 = vector.shape_cast %17 : vector<1x8x128xf32> to vector<8x128xf32>
      %cst = arith.constant 0.000000e+00 : f32
      %19 = vector.broadcast %cst : f32 to vector<8x128xf32>
      %c0_i32_10 = arith.constant 0 : i32
      %20 = arith.subi %16, %c0_i32_10 : i32
      %21 = arith.addi %c0_i32_10, %20 : i32
      %c1_i32_11 = arith.constant 1 : i32
      %22 = scf.for %arg5 = %c0_i32_10 to %21 step %c1_i32_11 iter_args(%arg6 = %19) -> (vector<8x128xf32>)  : i32 {
        %c8_i32_15 = arith.constant 8 : i32
        %27 = arith.muli %arg5, %c8_i32_15 : i32
        %28 = tpu.assume_multiple %27, 8 : i32
        %29 = arith.index_cast %28 : i32 to index
        %c0_16 = arith.constant 0 : index
        %30 = vector.load %arg2[%29, %c0_16] : memref<8x128xf32, #tpu.memory_space<vmem>>, vector<8x128xf32>
        %31 = arith.index_cast %28 : i32 to index
        %c0_17 = arith.constant 0 : index
        %32 = vector.load %arg3[%31, %c0_17] : memref<8x128xf32, #tpu.memory_space<vmem>>, vector<8x128xf32>
        %c8_i32_18 = arith.constant 8 : i32
        %33 = arith.muli %arg5, %c8_i32_18 : i32
        %34 = vector.broadcast %33 : i32 to vector<8x128xi32>
        %35 = arith.addi %13, %34 : vector<8x128xi32>
        %36 = vector.broadcast %6 : i32 to vector<8x128xi32>
        %37 = arith.cmpi slt, %35, %36 : vector<8x128xi32>
        %cst_19 = arith.constant 1.000000e+00 : f32
        %38 = vector.broadcast %cst_19 : f32 to vector<8x128xf32>
        %39 = arith.select %37, %32, %38 : vector<8x128xi1>, vector<8x128xf32>
        %cst_20 = arith.constant 1.000000e+00 : f32
        %40 = vector.broadcast %cst_20 : f32 to vector<8x128xf32>
        %41 = arith.select %37, %30, %40 : vector<8x128xi1>, vector<8x128xf32>
        %42 = arith.subf %39, %41 : vector<8x128xf32>
        %43 = tpu.reciprocal %39 : vector<8x128xf32> -> vector<8x128xf32>
        %44 = arith.mulf %42, %43 : vector<8x128xf32>
        %45 = math.absf %44 : vector<8x128xf32>
        %46 = arith.addf %arg6, %45 : vector<8x128xf32>
        scf.yield %46 : vector<8x128xf32>
      }
      %23 = arith.addf %18, %22 : vector<8x128xf32>
      %c0_12 = arith.constant 0 : index
      %c0_13 = arith.constant 0 : index
      %c0_14 = arith.constant 0 : index
      %24 = vector.load %arg4[%c0_12, %c0_13, %c0_14] : memref<1x8x128xf32, #tpu.memory_space<vmem>>, vector<1x8x128xf32>
      %25 = vector.shape_cast %24 : vector<1x8x128xf32> to vector<8x128xf32>
      %26 = vector.shape_cast %23 : vector<8x128xf32> to vector<1x8x128xf32>
      tpu.vector_store %arg4[%c0_12, %c0_13, %c0_14], %26 {strides = array<i32>} : memref<1x8x128xf32, #tpu.memory_space<vmem>>, vector<1x8x128xf32>,
    } else {
    }
    return
  }
  func.func @transform_0(%arg0: i32, %arg1: i32) -> (i32, i32) {
    %c1_i32 = arith.constant 1 : i32
    %0 = arith.muli %arg0, %c1_i32 : i32
    %1 = arith.addi %0, %arg1 : i32
    %c0_i32 = arith.constant 0 : i32
    %2 = arith.minsi %1, %c0_i32 : i32
    %c0_i32_0 = arith.constant 0 : i32
    %c0_i32_1 = arith.constant 0 : i32
    return %2, %c0_i32_0 : i32, i32
  }
  func.func @transform_1(%arg0: i32, %arg1: i32) -> (i32, i32) {
    %c1_i32 = arith.constant 1 : i32
    %0 = arith.muli %arg0, %c1_i32 : i32
    %1 = arith.addi %0, %arg1 : i32
    %c0_i32 = arith.constant 0 : i32
    %2 = arith.minsi %1, %c0_i32 : i32
    %c0_i32_0 = arith.constant 0 : i32
    %c0_i32_1 = arith.constant 0 : i32
    return %2, %c0_i32_0 : i32, i32
  }
  func.func @transform_2(%arg0: i32, %arg1: i32) -> (i32, i32, i32) {
    %c0_i32 = arith.constant 0 : i32
    %c0_i32_0 = arith.constant 0 : i32
    %c0_i32_1 = arith.constant 0 : i32
    return %arg0, %c0_i32, %c0_i32_0 : i32, i32, i32
  }
}

</mosaic_0001>

<bundles_post_ra>
// kernel: tpu_custom_call.1
= control target key start
LH: loop header
LB: loop body
LE: loop exit
PB: predicated region body
PF: predicated region fallthrough
CT: control target
= control target key end

     0   :  { %7 = vsyncpa [#allocation3], 0  ;;  %s310_s0 = inlined_call_operand.hbm [shape: f32[1,128], index: 0, kind: input, shape index: {}]   ;;  %s311_s1 = inlined_call_operand.vmem [shape: f32[1,128], index: 1, kind: input, shape index: {}]   ;;  %s312_s2 = inlined_call_operand.hbm [shape: f32[1,8,128], index: 2, kind: output, shape index: {}]  }
   0x1   :  { %8 = vsyncpa [#allocation4], 0 }
   0x2   :  { %19 = vsyncadd [#allocation3], 112  ;;  %s263_s9 = smov [#allocation2]   ;;  %s199_s13 = scalar_lea.hbm %s310_s0, 16 }
   0x3   :  { %s23_s10 = sshll.u32 %s263_s9, 4  ;;  %p200_p0 = scmp.ne.s32.totalorder %s310_s0, %s199_s13  ;;  %s24_s10 = int_to_ptr.vmem [resolvable:$true] %s23_s10 }
   0x4   :  { %p203_p1 = scmp.lt.u32.totalorder %s199_s13, %s310_s0 }
   0x6   :  { %p205_p2 = pnand %p203_p1, %p200_p0 }
   0x8   :  { %208 = shalt.err (!%p205_p2)
}
   0x9   :  { %s209_s18 = scalar_lea.vmem %s24_s10, 16  ;;  %s213_s19 = scalar_lea.vmem %s24_s10, 128 }
   0xa   :  { %p210_p3 = scmp.ne.s32.totalorder %s24_s10, %s209_s18  ;;  %p214_p4 = scmp.lt.s32.totalorder %s24_s10, %s24_s10 }
   0xb   :  { %p215_p5 = scmp.lt.s32.totalorder %s213_s19, %s209_s18 }
   0xd   :  { %p216_p6 = por %p215_p5, %p214_p4 }
   0xf   :  { %p217_p7 = pnand %p216_p6, %p210_p3 }
  0x11   :  { %220 = shalt.err (!%p217_p7)
}
  0x12   :  { %s264_s20 = smov 16   ;;  %s265_s21 = smov 1  }
  0x13   :  { %29 = dma.hbm_to_vmem [thread:$0]  %s310_s0, 16, %s24_s10, [#allocation3], %s264_s20, %s264_s20, %s265_s21  }
  0x14   :  { %251 = dma.done.wait [#allocation3], 128  }
  0x15   :  { %252 = vsyncadd [#allocation3], 4294967168  ;;  %v106_v0 = vlaneseq  ;;  %v266_v1 = vmov 0.0   ;;  %v255_v3 = vmov 0.0   ;;  %s259_s24 = smov 0  }
  0x16   :  { %84 = vst [vmem:[#allocation5] sm:$0xff] %v266_v1 }
  0x17   :  { %v107_v2 = vshrl.u32 %v106_v0, 7 }
  0x18 LB: > { %s175_s25 = sshll.u32 %s261_s24, 3  ;;  %s121_s24 = sadd.s32 1, %s261_s24   ;;  %s261_s24 = sphi %s259_s24, %s121_s24   ;;  %v257_v3 = vphi %v255_v3, %v256_v3  }
  0x19   : > { %s128_s28 = scalar_lea.vmem %s311_s1, %s175_s25  ;;  %v130_v4 = vstv %s175_s25  ;;  %s126_s0 = scalar_lea.vmem [#allocation2], %s175_s25 }
  0x1a   : > { %v129_v5 = vld [vmem:[%s128_s28] sm:$0xff]  ;;  %v131_v6 = vadd.s32 %v130_v4, %v107_v2  ;;  %p120_p8 = scmp.ge.s32.totalorder %s121_s24, 1 }
  0x1b   : > { %v127_v8 = vld [vmem:[%s126_s0] sm:$0xff]  ;;  %s267_s29 = smov (%p120_p8), [#allocation5]  }
  0x1c   : > { %vm133_vm0 = vcmp.lt.s32.totalorder %v131_v6, 1  ;;  %s149_s30 = sshll.u32 (%p120_p8), %s267_s29, 4  ;;  %s150_s30 = int_to_ptr.vmem [resolvable:$true] %s149_s30 }
  0x1d   : > { %v134_v7 = vsel %vm133_vm0, %v129_v5, 1.0  ;;  %v135_v9 = vsel %vm133_vm0, %v127_v8, 1.0  ;;  %s221_s3 = scalar_lea.vmem (%p120_p8), %s150_s30, 128  ;;  %p226_p10 = scmp.lt.s32.totalorder (%p120_p8), %s150_s30, %s150_s30 }
  0x1e   : > { %197 = vrcp.f32 %v134_v7  ;;  %v136_v10 = vsub.f32 %v134_v7, %v135_v9  ;;  %p222_p9 = scmp.ne.s32.totalorder (%p120_p8), %s150_s30, %s221_s3  ;;  %p227_p11 = scmp.lt.s32.totalorder (%p120_p8), %s221_s3, %s221_s3 }
  0x20   :  { %p228_p12 = por (%p120_p8), %p227_p11, %p226_p10 }
  0x22   :  { %p229_p13 = pnand (%p120_p8), %p228_p12, %p222_p9 }
  0x28   : > { %v198_v11 = vpop.eup %197 }
  0x29   : > { %v138_v12 = vmul.f32 %v198_v11, %v136_v10  ;;  %123 = sbr.rel (!%p120_p8) target bundleno = 24 (0x18), region = 57 }
  0x2b   : > { %v139_v13 = vand.u32 2147483647, %v138_v12 }
  0x2d   : > { %v140_v14 = vadd.f32 %v257_v3, %v139_v13  }
  0x2f   : > { %v256_v3 = vmov %v140_v14   ;;  %142 = vst [vmem:[#allocation5] sm:$0xff] (%p120_p8), %v140_v14 }
  0x30   :  { %232 = shalt.err (!%p229_p13)
}
  0x31   :  { %s233_s6 = scalar_lea.hbm %s312_s2, 128 }
  0x32   :  { %p234_p0 = scmp.ne.s32.totalorder %s312_s2, %s233_s6  ;;  %p237_p1 = scmp.lt.u32.totalorder %s233_s6, %s312_s2 }
  0x34   :  { %p239_p2 = pnand %p237_p1, %p234_p0 }
  0x36   :  { %242 = shalt.err (!%p239_p2)
}
  0x37   :  { %152 = dma.vmem_to_hbm [thread:$0]  %s150_s30, 128, %s312_s2, [#allocation4]  }
  0x38   :  { %253 = dma.done.wait [#allocation4], 128  }
  0x39   :  { %254 = vsyncadd [#allocation4], 4294967168 }
  0x3a   :  { %156 = vsyncpa [#allocation3], 1 }
  0x3b   :  { %157 = vsyncpa [#allocation4], 1 }

</bundles_post_ra>
